<compile_context>
chip_gen: v6e
topology: v6e:2x2x1
jax: 0.10.0
libtpu: 0.0.40
codegen_flags: <defaults>
</compile_context>

<pallas_src>
import jax
import jax.numpy as jnp
from jax import lax
from jax.experimental import pallas as pl
from jax.experimental.pallas import tpu as pltpu


_LANE = 128
_ONEHOT_MAX_K = 1024           # use the one-hot MXU gather only below this K
_ONEHOT_VMEM_BUDGET = 8 << 20  # per-tile budget for the (K, 2*B_tile) one-hot


def _round_up(x, m):
    return (x + m - 1) // m * m


def _cdiv(a, b):
    return (a + b - 1) // b


def _vmem_limit(estimate_bytes):
    # Explicit scoped-VMEM budget: generous headroom over the actual buffers,
    # capped well below v7x's 64 MiB physical VMEM so one setting compiles on
    # every generation.
    return int(min(max(2 * estimate_bytes, 16 << 20), 48 << 20))


def _pick_b_tile(b, per_lane_bytes, cap=2048):
    """Lane-dense batch tile.

    Guarantees >= 2 grid tiles whenever the batch allows it (so both v7x
    TensorCores get work under dimension_semantics=('parallel',)), caps the
    tile by an absolute cap (amortize the ~0.35us/grid-step overhead) and by
    the per-tile VMEM footprint of the one-hot intermediates.
    """
    vmem_cap = max(_LANE,
                   (_ONEHOT_VMEM_BUDGET // max(per_lane_bytes, 1)) // _LANE * _LANE)
    two_tiles = _round_up(_cdiv(b, 2), _LANE)
    return max(_LANE, min(cap, vmem_cap, two_tiles))


# ---------------------------------------------------------------------------
# Path A: one-hot MXU gather (small K).
# ---------------------------------------------------------------------------
def _onehot_kernel(fk_ref, tk_ref, table_t_ref, w_ref, b_ref, out_ref):
    # fk_ref/tk_ref : (1, B_tile) int32   indices, batch on lanes
    # table_t_ref   : (F, K)              transposed table (VMEM, grid-invariant)
    # w_ref         : (1, F) f32          linear weight row (VMEM, grid-invariant)
    # b_ref         : (1, 1) f32 (SMEM)   linear bias scalar
    # out_ref       : (1, B_tile) f32     lane-dense prediction row
    k = table_t_ref.shape[1]
    b_tile = fk_ref.shape[1]
    tdt = table_t_ref.dtype

    # One (1, 2*B_tile) index row -> ONE one-hot -> ONE gather matmul for both
    # embeddings.  The result halves split at a 128-lane boundary (no relayout).
    idx_row = jnp.concatenate([fk_ref[...], tk_ref[...]], axis=1)      # (1, 2B)
    # NOTE: iota is regenerated per grid step on purpose — hoisting it into a
    # persistent scratch initialized under program_id==0 is unsafe once the
    # "parallel" batch axis is sharded across v7x TensorCores.
    iota_k = lax.broadcasted_iota(jnp.int32, (k, 2 * b_tile), 0)
    # One-hot built directly in the matmul dtype: single compare + select.
    # (Out-of-range indices select nothing -> zero embedding, whereas PyTorch
    # nn.Embedding would raise; inputs are assumed validated.)
    onehot = jnp.where(iota_k == idx_row,
                       jnp.ones((), tdt), jnp.zeros((), tdt))          # (K, 2B)

    # Exact selection for f32 tables (avoid silent bf16 rounding on the MXU).
    # bf16 tables are already exact at default precision (1.0 * x, f32 acc).
    prec = (lax.Precision.HIGHEST if tdt == jnp.float32
            else lax.Precision.DEFAULT)
    gathered = jnp.dot(table_t_ref[...], onehot,
                       preferred_element_type=jnp.float32,
                       precision=prec)                                  # (F, 2B)

    # GMF elementwise product (VPU), batch stays on lanes.
    prod_t = gathered[:, :b_tile] * gathered[:, b_tile:]                # (F, B)

    # Lane-dense projection: (1, F) @ (F, B_tile) -> no masked vst partials.
    pred = jnp.dot(w_ref[...], prod_t,
                   preferred_element_type=jnp.float32,
                   precision=lax.Precision.HIGHEST)                     # (1, B)
    out_ref[...] = pred + b_ref[0, 0]


def _onehot_forward(fromk, tok, table_t, w_row, bias):
    f, k = table_t.shape
    b = fromk.shape[0]
    itemsize = jnp.dtype(table_t.dtype).itemsize

    # Per extra batch lane: one-hot column + gathered/product f32 columns.
    per_lane = 2 * k * max(itemsize, 4) + 3 * f * 4 + 16
    b_tile = _pick_b_tile(b, per_lane, cap=2048)
    b_pad = _round_up(b, b_tile)
    n_tiles = b_pad // b_tile

    # Pad with index 0 (a valid row); padded lanes are sliced off afterwards.
    fk = jnp.zeros((1, b_pad), jnp.int32).at[0, :b].set(fromk.astype(jnp.int32))
    tk = jnp.zeros((1, b_pad), jnp.int32).at[0, :b].set(tok.astype(jnp.int32))

    table_bytes = f * k * itemsize
    est = (2 * table_bytes + 2 * f * 4                 # invariant blocks (dbl-buffered)
           + 4 * (2 * b_tile * 4) + 2 * b_tile * 4     # index / output blocks
           + 2 * k * b_tile * max(itemsize, 4)         # one-hot intermediate
           + 3 * f * b_tile * 4)                       # gathered halves + product
    # TODO(synk): once validated on hardware, mark the grid-invariant table /
    # weight specs pipeline_mode=pl.Buffered(1) to drop their second buffer
    # (matters for large tables on v7x's 64 MiB VMEM).

    cost = pl.CostEstimate(
        flops=2 * f * k * (2 * b_pad) + 3 * f * b_pad,
        transcendentals=0,
        bytes_accessed=table_bytes + 2 * b_pad * 4 + b_pad * 4 + f * 4)

    out = pl.pallas_call(
        _onehot_kernel,
        out_shape=jax.ShapeDtypeStruct((1, b_pad), jnp.float32),
        grid_spec=pltpu.PrefetchScalarGridSpec(
            num_scalar_prefetch=0,
            grid=(n_tiles,),
            in_specs=[
                pl.BlockSpec((1, b_tile), lambda i: (0, i)),   # fromk
                pl.BlockSpec((1, b_tile), lambda i: (0, i)),   # tok
                pl.BlockSpec((f, k), lambda i: (0, 0)),        # table^T (invariant)
                pl.BlockSpec((1, f), lambda i: (0, 0)),        # weight row (invariant)
                pl.BlockSpec(memory_space=pltpu.SMEM),         # bias scalar
            ],
            out_specs=pl.BlockSpec((1, b_tile), lambda i: (0, i)),
        ),
        compiler_params=pltpu.CompilerParams(
            dimension_semantics=("parallel",),
            vmem_limit_bytes=_vmem_limit(est)),
        cost_estimate=cost,
    )(fk, tk, table_t, w_row, bias)

    return out.reshape(-1)[:b]


# ---------------------------------------------------------------------------
# Path B: row gather (large K) — O(B*F), no (K, B_tile) intermediates.
# ---------------------------------------------------------------------------
def _gather_kernel(fk_smem, tk_smem, table_ref, w_ref, b_ref, out_ref,
                   ef_ref, et_ref):
    # fk_smem/tk_smem : (B_pad,) int32 (SMEM, scalar-prefetched indices)
    # table_ref       : (K, F)          table (VMEM, grid-invariant)
    # w_ref           : (1, F) f32      linear weight row
    # b_ref           : (1, 1) f32      (SMEM) bias scalar
    # out_ref         : (B_tile, 1) f32
    # ef_ref/et_ref   : (B_tile, F)     gather scratch
    b_tile = out_ref.shape[0]
    base = pl.program_id(0) * b_tile

    def gather_row(r, carry):
        ef_ref[pl.ds(r, 1), :] = table_ref[pl.ds(fk_smem[base + r], 1), :]
        et_ref[pl.ds(r, 1), :] = table_ref[pl.ds(tk_smem[base + r], 1), :]
        return carry

    lax.fori_loop(0, b_tile, gather_row, 0, unroll=False)

    prod = ef_ref[...].astype(jnp.float32) * et_ref[...].astype(jnp.float32)
    pred = jnp.sum(prod * w_ref[...], axis=1, keepdims=True)   # (B_tile, 1)
    out_ref[...] = pred + b_ref[0, 0]


def _gather_forward(fromk, tok, table, w_row, bias):
    k, f = table.shape
    b = fromk.shape[0]
    itemsize = jnp.dtype(table.dtype).itemsize

    b_tile = max(_LANE, min(1024, _round_up(_cdiv(b, 2), _LANE)))
    b_pad = _round_up(b, b_tile)
    n_tiles = b_pad // b_tile

    # Pad with 0 (a valid row) and clamp so dynamic row reads never walk off
    # the VMEM table (PyTorch would raise on out-of-range indices instead).
    fk = jnp.zeros((b_pad,), jnp.int32).at[:b].set(
        jnp.clip(fromk.astype(jnp.int32), 0, k - 1))
    tk = jnp.zeros((b_pad,), jnp.int32).at[:b].set(
        jnp.clip(tok.astype(jnp.int32), 0, k - 1))

    table_bytes = k * f * itemsize
    est = (2 * table_bytes + 2 * f * 4
           + 2 * b_tile * f * itemsize + 4 * b_tile * 4)
    # TODO(synk): for tables too large for VMEM (roughly > 24 MiB), keep the
    # table in HBM (memory_space=pl.ANY) and DMA batched rows instead of a
    # resident VMEM block.

    cost = pl.CostEstimate(
        flops=3 * b_pad * f,
        transcendentals=0,
        bytes_accessed=2 * b_pad * f * itemsize + 2 * b_pad * 4 + b_pad * 4 + f * 4)

    out = pl.pallas_call(
        _gather_kernel,
        out_shape=jax.ShapeDtypeStruct((b_pad, 1), jnp.float32),
        grid_spec=pltpu.PrefetchScalarGridSpec(
            num_scalar_prefetch=2,
            grid=(n_tiles,),
            in_specs=[
                pl.BlockSpec((k, f), lambda i, fk_s, tk_s: (0, 0)),   # table (invariant)
                pl.BlockSpec((1, f), lambda i, fk_s, tk_s: (0, 0)),   # weight row
                pl.BlockSpec(memory_space=pltpu.SMEM),                # bias scalar
            ],
            out_specs=pl.BlockSpec((b_tile, 1), lambda i, fk_s, tk_s: (i, 0)),
            scratch_shapes=[pltpu.VMEM((b_tile, f), table.dtype),
                            pltpu.VMEM((b_tile, f), table.dtype)],
        ),
        compiler_params=pltpu.CompilerParams(
            dimension_semantics=("parallel",),
            vmem_limit_bytes=_vmem_limit(est)),
        cost_estimate=cost,
    )(fk, tk, table, w_row, bias)

    return out.reshape(-1)[:b]


# ---------------------------------------------------------------------------
# Public API.
# ---------------------------------------------------------------------------
def init_knowledge_mf(embed_weight, lin_weight, lin_bias, table_dtype=None):
    """Prepare parameters once (transpose / casts hoisted out of the hot path)."""
    embed_weight = jnp.asarray(embed_weight)
    if table_dtype is not None:
        # Optional bf16 table: halves HBM/VMEM traffic and runs the one-hot
        # gather single-pass on the v5e MXU, at documented embedding rounding.
        embed_weight = embed_weight.astype(table_dtype)
    k, f = embed_weight.shape
    params = {
        "knowledge_num": int(k),
        "factor_num": int(f),
        "use_onehot": int(k) <= _ONEHOT_MAX_K,
        "w_row": jnp.asarray(lin_weight, jnp.float32).reshape(1, f),
        "bias": jnp.asarray(lin_bias, jnp.float32).reshape(1, 1),
    }
    if params["use_onehot"]:
        params["table_t"] = embed_weight.T      # (F, K), materialized once
    else:
        params["table"] = embed_weight          # (K, F)
    return params


def knowledge_mf_forward(fromk, tok, params):
    """fromk/tok: int (B,). Returns (B,) predictions (== prediction.view(-1))."""
    if params["use_onehot"]:
        return _onehot_forward(fromk, tok, params["table_t"],
                               params["w_row"], params["bias"])
    return _gather_forward(fromk, tok, params["table"],
                           params["w_row"], params["bias"])


def reference_forward(fromk, tok, embed_weight, lin_weight, lin_bias):
    e_from = jnp.take(embed_weight, fromk, axis=0)
    e_to = jnp.take(embed_weight, tok, axis=0)
    prod = e_from * e_to
    return jnp.sum(prod * lin_weight.reshape(1, -1), axis=-1) + lin_bias[0]


if __name__ == "__main__":
    knowledge_num = 64
    factor_num = 32
    batch = 8

    key = jax.random.PRNGKey(0)
    k_embed, k_lin, k_from, k_to = jax.random.split(key, 4)

    # Deterministic param init mirroring the module's _init_weight_:
    #   embedding ~ N(0, 0.01), linear bias zeroed, linear weight small uniform.
    embed_weight = 0.01 * jax.random.normal(
        k_embed, (knowledge_num, factor_num), dtype=jnp.float32)
    bound = 1.0 / float(factor_num) ** 0.5
    lin_weight = jax.random.uniform(
        k_lin, (1, factor_num), minval=-bound, maxval=bound, dtype=jnp.float32)
    lin_bias = jnp.zeros((1,), dtype=jnp.float32)

    fromk = jax.random.randint(k_from, (batch,), 0, knowledge_num, dtype=jnp.int32)
    tok = jax.random.randint(k_to, (batch,), 0, knowledge_num, dtype=jnp.int32)

    params = init_knowledge_mf(embed_weight, lin_weight, lin_bias)
    out = knowledge_mf_forward(fromk, tok, params)
    out = jax.block_until_ready(out)

    ref = reference_forward(fromk, tok, embed_weight, lin_weight, lin_bias)
    assert out.shape == (batch,)
    assert jnp.allclose(out, ref, atol=1e-5, rtol=1e-5), (out, ref)

    print("KERNEL_OK")
</pallas_src>

<mosaic_0001>
module attributes {stable_mosaic.version = 11 : i64} {
  func.func @_onehot_kernel(%arg0: i32, %arg1: memref<1x128xi32, #tpu.memory_space<vmem>>, %arg2: memref<1x128xi32, #tpu.memory_space<vmem>>, %arg3: memref<32x64xf32, #tpu.memory_space<vmem>>, %arg4: memref<1x32xf32, #tpu.memory_space<vmem>>, %arg5: memref<1x1xf32, #tpu.memory_space<smem>>, %arg6: memref<1x128xf32, #tpu.memory_space<vmem>>) attributes {dimension_semantics = [#tpu.dimension_semantics<parallel>], iteration_bounds = array<i64: 1>, scalar_prefetch = 0 : i64, scratch_operands = 0 : i64, tpu.core_type = #tpu.core_type<tc>, window_params = [{transform_indices = @transform_0, window_bounds = array<i64: 1, 128>}, {transform_indices = @transform_1, window_bounds = array<i64: 1, 128>}, {pipeline_mode = #tpu.pipeline_mode<synchronous>, transform_indices = @transform_2, window_bounds = array<i64: 32, 64>}, {pipeline_mode = #tpu.pipeline_mode<synchronous>, transform_indices = @transform_3, window_bounds = array<i64: 1, 32>}, {transform_indices = @transform_4, window_bounds = array<i64: 1, 1>}, {transform_indices = @transform_5, window_bounds = array<i64: 1, 128>}]} {
    %c0 = arith.constant 0 : index
    %c0_0 = arith.constant 0 : index
    %0 = vector.load %arg1[%c0, %c0_0] : memref<1x128xi32, #tpu.memory_space<vmem>>, vector<1x128xi32>
    %c0_1 = arith.constant 0 : index
    %c0_2 = arith.constant 0 : index
    %1 = vector.load %arg2[%c0_1, %c0_2] : memref<1x128xi32, #tpu.memory_space<vmem>>, vector<1x128xi32>
    %2 = tpu.concatenate %0, %1 in 1 : vector<1x128xi32>, vector<1x128xi32> -> vector<1x256xi32>
    %3 = tpu.iota {dimensions = array<i32: 0>} : vector<64x256xi32>
    %4 = vector.broadcast %2 : vector<1x256xi32> to vector<64x256xi32>
    %5 = arith.cmpi eq, %3, %4 : vector<64x256xi32>
    %cst = arith.constant 1.000000e+00 : f32
    %cst_3 = arith.constant 0.000000e+00 : f32
    %6 = vector.broadcast %cst : f32 to vector<64x256xf32>
    %7 = vector.broadcast %cst_3 : f32 to vector<64x256xf32>
    %8 = arith.select %5, %6, %7 : vector<64x256xi1>, vector<64x256xf32>
    %c0_4 = arith.constant 0 : index
    %c0_5 = arith.constant 0 : index
    %9 = vector.load %arg3[%c0_4, %c0_5] : memref<32x64xf32, #tpu.memory_space<vmem>>, vector<32x64xf32>
    %cst_6 = arith.constant dense<0.000000e+00> : vector<32x256xf32>
    %10 = tpu.matmul %9, %8, %cst_6 {dimension_numbers = #tpu.dot_dimension_numbers<[1], [0], [0], [1], [0, 0, 1, 1], [], []>, precision = #tpu.contract_precision<fp32>} : vector<32x64xf32>, vector<64x256xf32>, vector<32x256xf32> -> vector<32x256xf32>
    %11 = vector.extract_strided_slice %10 {offsets = [0, 0], sizes = [32, 128], strides = [1, 1]} : vector<32x256xf32> to vector<32x128xf32>
    %12 = vector.extract_strided_slice %10 {offsets = [0, 128], sizes = [32, 128], strides = [1, 1]} : vector<32x256xf32> to vector<32x128xf32>
    %13 = arith.mulf %11, %12 : vector<32x128xf32>
    %c0_7 = arith.constant 0 : index
    %c0_8 = arith.constant 0 : index
    %14 = vector.load %arg4[%c0_7, %c0_8] : memref<1x32xf32, #tpu.memory_space<vmem>>, vector<1x32xf32>
    %cst_9 = arith.constant dense<0.000000e+00> : vector<1x128xf32>
    %15 = tpu.matmul %14, %13, %cst_9 {dimension_numbers = #tpu.dot_dimension_numbers<[1], [0], [0], [1], [0, 0, 1, 1], [], []>, precision = #tpu.contract_precision<fp32>} : vector<1x32xf32>, vector<32x128xf32>, vector<1x128xf32> -> vector<1x128xf32>
    %c0_10 = arith.constant 0 : index
    %c0_11 = arith.constant 0 : index
    %16 = memref.load %arg5[%c0_10, %c0_11] : memref<1x1xf32, #tpu.memory_space<smem>>
    %17 = vector.broadcast %16 : f32 to vector<1x128xf32>
    %18 = arith.addf %15, %17 : vector<1x128xf32>
    %c0_12 = arith.constant 0 : index
    %c0_13 = arith.constant 0 : index
    %19 = vector.load %arg6[%c0_12, %c0_13] : memref<1x128xf32, #tpu.memory_space<vmem>>, vector<1x128xf32>
    tpu.vector_store %arg6[%c0_12, %c0_13], %18 {strides = array<i32>} : memref<1x128xf32, #tpu.memory_space<vmem>>, vector<1x128xf32>,
    return
  }
  func.func @transform_0(%arg0: i32) -> (i32, i32) {
    %c0_i32 = arith.constant 0 : i32
    %c0_i32_0 = arith.constant 0 : i32
    return %c0_i32, %arg0 : i32, i32
  }
  func.func @transform_1(%arg0: i32) -> (i32, i32) {
    %c0_i32 = arith.constant 0 : i32
    %c0_i32_0 = arith.constant 0 : i32
    return %c0_i32, %arg0 : i32, i32
  }
  func.func @transform_2(%arg0: i32) -> (i32, i32) {
    %c0_i32 = arith.constant 0 : i32
    %c0_i32_0 = arith.constant 0 : i32
    %c0_i32_1 = arith.constant 0 : i32
    return %c0_i32, %c0_i32_0 : i32, i32
  }
  func.func @transform_3(%arg0: i32) -> (i32, i32) {
    %c0_i32 = arith.constant 0 : i32
    %c0_i32_0 = arith.constant 0 : i32
    %c0_i32_1 = arith.constant 0 : i32
    return %c0_i32, %c0_i32_0 : i32, i32
  }
  func.func @transform_4(%arg0: i32) -> (i32, i32) {
    %c0_i32 = arith.constant 0 : i32
    %c0_i32_0 = arith.constant 0 : i32
    %c0_i32_1 = arith.constant 0 : i32
    return %c0_i32, %c0_i32_0 : i32, i32
  }
  func.func @transform_5(%arg0: i32) -> (i32, i32) {
    %c0_i32 = arith.constant 0 : i32
    %c0_i32_0 = arith.constant 0 : i32
    return %c0_i32, %arg0 : i32, i32
  }
}

</mosaic_0001>

<bundles_post_ra>
// kernel: tpu_custom_call.1
= control target key start
LH: loop header
LB: loop body
LE: loop exit
PB: predicated region body
PF: predicated region fallthrough
CT: control target
= control target key end

     0   :  { %11 = vsyncpa [#allocation4], 0  ;;  %s2182_s0 = inlined_call_operand.vmem [shape: s32[1,128], index: 0, kind: input, shape index: {}]   ;;  %s2183_s1 = inlined_call_operand.vmem [shape: s32[1,128], index: 1, kind: input, shape index: {}]   ;;  %s2184_s2 = inlined_call_operand.hbm [shape: f32[32,64], index: 2, kind: input, shape index: {}]   ;;  %s2185_s3 = inlined_call_operand.vmem [shape: f32[1,32], index: 3, kind: input, shape index: {}]   ;;  %s2186_s4 = inlined_call_operand.<no memory space> [shape: f32[1,1], index: 4, kind: input, shape index: {}]   ;;  %s2187_s5 = inlined_call_operand.hbm [shape: f32[1,128], index: 5, kind: output, shape index: {}]  }
   0x1   :  { %12 = vsyncpa [#allocation5], 0  ;;  %s1511_s18 = smov [#allocation3]  }
   0x2   :  { %s22_s19 = sshll.u32 %s1511_s18, 4  ;;  %s23_s19 = int_to_ptr.vmem [resolvable:$true] %s22_s19 }
   0x3   :  { %s1475_s20 = scalar_lea.vmem %s23_s19, 512  ;;  %p1480_p1 = scmp.lt.s32.totalorder %s23_s19, %s23_s19 }
   0x4   :  { %p1476_p0 = scmp.ne.s32.totalorder %s23_s19, %s1475_s20  ;;  %p1481_p2 = scmp.lt.s32.totalorder %s1475_s20, %s1475_s20 }
   0x6   :  { %p1482_p3 = por %p1481_p2, %p1480_p1 }
   0x8   :  { %p1483_p4 = pnand %p1482_p3, %p1476_p0 }
   0xa   :  { %1486 = shalt.err (!%p1483_p4)
}
   0xb   :  { %s1512_s21 = smov 128   ;;  %s1513_s22 = smov 8  }
   0xc   :  { %28 = dma.hbm_to_vmem [thread:$0]  %s2184_s2, 512, %s23_s19, [#allocation4], %s1512_s21, %s1512_s21, %s1513_s22  }
   0xd   :  { %1507 = dma.done.wait [#allocation4], 512  }
   0xe   :  { %1508 = vsyncadd [#allocation4], 4294966784  ;;  %v38_v0 = vlaneseq  ;;  %v1514_v1 = vmov 0.0   ;;  %v1573_v8 = vld [vmem:[%s2183_s1] ss:$0 sm:$0xff]  ;;  %v1515_v12 = vmov 1.0  }
   0xf   :  { %168 = vmatprep.mubr.f32.mxu0 %v1514_v1  ;;  %341 = vmatprep.mubr.f32.mxu1 %v1514_v1  ;;  %v1578_v9 = vld [vmem:[%s2182_s0] ss:$0 sm:$0xff]  ;;  %vm91_vm10 = vcmask 523264   ;;  %v88_v62 = vld [vmem:[#allocation3 + $0x8] sm:$0xff]  ;;  %s1517_s29 = smov [#allocation6]  }
  0x10   :  { %v1553_v2 = vshrl.u32 %v38_v0, 7  ;;  %v87_v54 = vld [vmem:[#allocation3] sm:$0xff]  ;;  %s1305_s30 = sshll.u32 %s1517_s29, 4  ;;  %s1306_s30 = int_to_ptr.vmem [resolvable:$true] %s1305_s30 }
  0x11   :  { %s1491_s6 = scalar_lea.vmem %s1306_s30, 32  ;;  %p1492_p6 = scmp.lt.s32.totalorder %s1306_s30, %s1306_s30 }
  0x12   :  { %v1556_v3 = vadd.s32 56, %v1553_v2  ;;  %v1559_v4 = vadd.s32 48, %v1553_v2  ;;  %v1562_v5 = vadd.s32 40, %v1553_v2  ;;  %v1565_v6 = vadd.s32 32, %v1553_v2 }
  0x13   :  { %v1568_v7 = vadd.s32 24, %v1553_v2  ;;  %v1581_v10 = vadd.s32 16, %v1553_v2  ;;  %v1584_v11 = vadd.s32 8, %v1553_v2  ;;  %vm56_vm15 = vcmp.eq.s32.totalorder %v1553_v2, %v1573_v8 }
  0x14   :  { %vm70_vm0 = vcmp.eq.s32.totalorder %v1556_v3, %v1573_v8  ;;  %vm69_vm1 = vcmp.eq.s32.totalorder %v1556_v3, %v1578_v9  ;;  %vm68_vm2 = vcmp.eq.s32.totalorder %v1559_v4, %v1573_v8  ;;  %vm67_vm3 = vcmp.eq.s32.totalorder %v1559_v4, %v1578_v9 }
  0x15   :  { %1316 = vmatprep.subr.msk.mxu0 %vm70_vm0, %v1515_v12  ;;  %v84_v13 = vsel %vm68_vm2, 1.0, %v1514_v1  ;;  %v83_v14 = vsel %vm67_vm3, 1.0, %v1514_v1  ;;  %vm66_vm4 = vcmp.eq.s32.totalorder %v1562_v5, %v1573_v8  ;;  %vm65_vm5 = vcmp.eq.s32.totalorder %v1562_v5, %v1578_v9 }
  0x16   :  { %1317 = vmatpush1.msk.msra.mxu0 %vm69_vm1, %v1515_v12  ;;  %v1614_v15 = vsub.f32 %v84_v13, %v84_v13  ;;  %v1616_v16 = vsub.f32 %v83_v14, %v83_v14  ;;  %v82_v17 = vsel %vm66_vm4, 1.0, %v1514_v1  ;;  %v81_v18 = vsel %vm65_vm5, 1.0, %v1514_v1 }
  0x17   :  { %1318 = vmatprep.subr.msk.mxu0 %vm68_vm2, %v1515_v12  ;;  %v1630_v19 = vsub.f32 %v82_v17, %v82_v17  ;;  %v1632_v20 = vsub.f32 %v81_v18, %v81_v18  ;;  %vm64_vm6 = vcmp.eq.s32.totalorder %v1565_v6, %v1573_v8  ;;  %vm63_vm7 = vcmp.eq.s32.totalorder %v1565_v6, %v1578_v9 }
  0x18   :  { %1319 = vmatpush1.msk.msra.mxu0 %vm67_vm3, %v1515_v12  ;;  %v80_v21 = vsel %vm64_vm6, 1.0, %v1514_v1  ;;  %v79_v22 = vsel %vm63_vm7, 1.0, %v1514_v1  ;;  %vm62_vm8 = vcmp.eq.s32.totalorder %v1568_v7, %v1573_v8  ;;  %vm61_vm9 = vcmp.eq.s32.totalorder %v1568_v7, %v1578_v9 }
  0x19   :  { %1320 = vmatprep.subr.msk.mxu0 %vm66_vm4, %v1515_v12  ;;  %v1658_v23 = vsub.f32 %v80_v21, %v80_v21  ;;  %v1660_v24 = vsub.f32 %v79_v22, %v79_v22  ;;  %v78_v25 = vsel %vm62_vm8, 1.0, %v1514_v1  ;;  %v77_v26 = vsel %vm61_vm9, 1.0, %v1514_v1 }
  0x1a   :  { %1321 = vmatpush1.msk.msra.mxu0 %vm65_vm5, %v1515_v12  ;;  %v1674_v27 = vsub.f32 %v78_v25, %v78_v25  ;;  %v1676_v28 = vsub.f32 %v77_v26, %v77_v26  ;;  %v86_v29 = vsel %vm70_vm0, 1.0, %v1514_v1  ;;  %vm60_vm11 = vcmp.eq.s32.totalorder %v1581_v10, %v1573_v8 }
  0x1b   :  { %1322 = vmatprep.subr.msk.mxu0 %vm64_vm6, %v1515_v12  ;;  %v1688_v30 = vsub.f32 %v86_v29, %v86_v29  ;;  %v76_v31 = vsel %vm60_vm11, 1.0, %v1514_v1  ;;  %v85_v32 = vsel %vm69_vm1, 1.0, %v1514_v1  ;;  %vm59_vm12 = vcmp.eq.s32.totalorder %v1581_v10, %v1578_v9 }
  0x1c   :  { %1323 = vmatpush1.msk.msra.mxu0 %vm63_vm7, %v1515_v12  ;;  %v1704_v33 = vsub.f32 %v76_v31, %v76_v31  ;;  %v1706_v34 = vsub.f32 %v85_v32, %v85_v32  ;;  %v75_v35 = vsel %vm59_vm12, 1.0, %v1514_v1  ;;  %v240_v36 = vand.u32 4294901760, %v1614_v15 }
  0x1d   :  { %1324 = vmatprep.subr.msk.mxu0 %vm62_vm8, %v1515_v12  ;;  %v230_v37 = vand.u32 4294901760, %v1688_v30  ;;  %v1718_v38 = vsub.f32 %v75_v35, %v75_v35  ;;  %vm2188_vm13 = vcmp.eq.s32.totalorder %v1584_v11, %v1573_v8  ;;  %v245_v39 = vand.u32 4294901760, %v1616_v16 }
  0x1e   :  { %1325 = vmatpush1.msk.msra.mxu0 %vm61_vm9, %v1515_v12  ;;  %v235_v40 = vand.u32 4294901760, %v1706_v34  ;;  %v241_v41 = vsub.f32 %v1614_v15, %v240_v36  ;;  %v74_v42 = vsel %vm2188_vm13, 1.0, %v1514_v1  ;;  %vm57_vm14 = vcmp.eq.s32.totalorder %v1584_v11, %v1578_v9 }
  0x1f   :  { %v231_v43 = vsub.f32 %v1688_v30, %v230_v37  ;;  %1326 = vmatprep.subr.msk.mxu0 %vm60_vm11, %v1515_v12  ;;  %v1744_v44 = vsub.f32 %v74_v42, %v74_v42  ;;  %v246_v45 = vsub.f32 %v1616_v16, %v245_v39  ;;  %v73_v46 = vsel %vm57_vm14, 1.0, %v1514_v1 }
  0x20   :  { %v236_v47 = vsub.f32 %v1706_v34, %v235_v40  ;;  %1327 = vmatpush1.msk.msra.mxu0 %vm59_vm12, %v1515_v12  ;;  %v242_v48 = vand.u32 4294901760, %v241_v41  ;;  %v1760_v49 = vsub.f32 %v73_v46, %v73_v46  ;;  %v250_v50 = vand.u32 4294901760, %v1630_v19 }
  0x21   :  { %v232_v51 = vand.u32 4294901760, %v231_v43  ;;  %1328 = vmatprep.subr.msk.mxu0 %vm2188_vm13, %v1515_v12  ;;  %v247_v52 = vand.u32 4294901760, %v246_v45  ;;  %v255_v53 = vand.u32 4294901760, %v1632_v20  ;;  %v72_v57 = vsel %vm56_vm15, 1.0, %v1514_v1 }
  0x22   :  { %v237_v55 = vand.u32 4294901760, %v236_v47  ;;  %1329 = vmatpush1.msk.msra.mxu0 %vm57_vm14, %v1515_v12  ;;  %v251_v56 = vsub.f32 %v1630_v19, %v250_v50  ;;  %vm55_vm13 = vcmp.eq.s32.totalorder %v1553_v2, %v1578_v9  ;;  %v1787_v58 = vsub.f32 %v72_v57, %v72_v57 }
  0x23   :  { %233 = vmatprep.subr.mxu1 %v232_v51  ;;  %1330 = vmatprep.subr.msk.mxu0 %vm56_vm15, %v1515_v12  ;;  %v256_v59 = vsub.f32 %v1632_v20, %v255_v53  ;;  %v71_v60 = vsel %vm55_vm13, 1.0, %v1514_v1  ;;  %v260_v61 = vand.u32 4294901760, %v1658_v23  ;;  %v93_v13 = vsel %vm91_vm10, %v87_v54, 0 }
  0x24   :  { %238 = vmatpush1.msra.mxu1 %v237_v55  ;;  %v252_v63 = vand.u32 4294901760, %v251_v56  ;;  %1331 = vmatpush1.msk.msra.mxu0 %vm55_vm13, %v1515_v12  ;;  %v1801_v0 = vsub.f32 %v71_v60, %v71_v60  ;;  %v265_v14 = vand.u32 4294901760, %v1660_v24  ;;  %v1808_v21 = vand.u32 4294901760, %v93_v13  ;;  %v89_v55 = vld [vmem:[#allocation3 + $0x10] sm:$0xff] }
  0x25   :  { %243 = vmatprep.subr.mxu1 %v242_v48  ;;  %v257_v17 = vand.u32 4294901760, %v256_v59  ;;  %v261_v18 = vsub.f32 %v1658_v23, %v260_v61  ;;  %387 = vmatprep.subr.mxu0 %v1688_v30  ;;  %v270_v22 = vand.u32 4294901760, %v1674_v27  ;;  %v275_v26 = vand.u32 4294901760, %v1676_v28 }
  0x26   :  { %248 = vmatpush1.msra.mxu1 %v247_v52  ;;  %v266_v25 = vsub.f32 %v1660_v24, %v265_v14  ;;  %v280_v29 = vand.u32 4294901760, %v1704_v33  ;;  %v96_v31 = vsel %vm91_vm10, %v88_v62, 0  ;;  %v1819_v35 = vsub.f32 %v93_v13, %v1808_v21 }
  0x27   :  { %253 = vmatprep.subr.mxu1 %v252_v63  ;;  %v262_v32 = vand.u32 4294901760, %v261_v18  ;;  %v271_v41 = vsub.f32 %v1674_v27, %v270_v22  ;;  %v1824_v42 = vand.u32 4294901760, %v96_v31  ;;  %v276_v45 = vsub.f32 %v1676_v28, %v275_v26  ;;  %v90_v18 = vld [vmem:[#allocation3 + $0x18] sm:$0xff] }
  0x28   :  { %258 = vmatpush1.msra.mxu1 %v257_v17  ;;  %v267_v43 = vand.u32 4294901760, %v266_v25  ;;  %v281_v46 = vsub.f32 %v1704_v33, %v280_v29  ;;  %v285_v47 = vand.u32 4294901760, %v1718_v38  ;;  %v171_v48 = vand.u32 4294901760, %v1819_v35 }
  0x29   :  { %263 = vmatprep.subr.mxu1 %v262_v32  ;;  %v272_v51 = vand.u32 4294901760, %v271_v41  ;;  %v1835_v52 = vsub.f32 %v96_v31, %v1824_v42  ;;  %v290_v54 = vand.u32 4294901760, %v1744_v44  ;;  %v277_v56 = vand.u32 4294901760, %v276_v45 }
  0x2a   :  { %268 = vmatpush1.msra.mxu1 %v267_v43  ;;  %v282_v57 = vand.u32 4294901760, %v281_v46  ;;  %v286_v59 = vsub.f32 %v1718_v38, %v285_v47  ;;  %v2189_v60 = vand.u32 4294901760, %v1760_v49  ;;  %v172_v62 = vsub.f32 %v1819_v35, %v171_v48 }
  0x2b   :  { %273 = vmatprep.subr.mxu1 %v272_v51  ;;  %v2190_v63 = vand.u32 4294901760, %v1835_v52  ;;  %v291_v13 = vsub.f32 %v1744_v44, %v290_v54  ;;  %v300_v17 = vand.u32 4294901760, %v1787_v58  ;;  %v99_v32 = vsel %vm91_vm10, %v89_v55, 0 }
  0x2c   :  { %278 = vmatpush1.msra.mxu1 %v277_v56  ;;  %v287_v25 = vand.u32 4294901760, %v286_v59  ;;  %v296_v31 = vsub.f32 %v1760_v49, %v2189_v60  ;;  %v305_v41 = vand.u32 4294901760, %v1801_v0  ;;  %v173_v43 = vand.u32 4294901760, %v172_v62 }
  0x2d   :  { %283 = vmatprep.subr.mxu1 %v282_v57  ;;  %v183_v45 = vsub.f32 %v1835_v52, %v2190_v63  ;;  %v292_v46 = vand.u32 4294901760, %v291_v13  ;;  %v301_v51 = vsub.f32 %v1787_v58, %v300_v17  ;;  %v1861_v59 = vand.u32 4294901760, %v99_v32 }
  0x2e   :  { %288 = vmatpush1.msra.mxu1 %v287_v25  ;;  %v297_v56 = vand.u32 4294901760, %v296_v31  ;;  %v306_v55 = vsub.f32 %v1801_v0, %v305_v41  ;;  %v102_v62 = vsel %vm91_vm10, %v90_v18, 0  ;;  %174 = vmatmul.mubr.f32.vlgmr.msra.gmra.mxu0 %v173_v43  ;;  %vm2191_vm10 = vcmp.eq.s32.totalorder %v1584_v11, %v1573_v8 }
  0x2f   :  { %v184_v57 = vand.u32 4294901760, %v183_v45  ;;  %293 = vmatprep.subr.mxu1 %v292_v46  ;;  %v302_v60 = vand.u32 4294901760, %v301_v51  ;;  %v1867_v63 = vand.u32 4294901760, %v102_v62  ;;  %389 = vmatpush1.msra.mxu0 %v1706_v34  ;;  %v1872_v13 = vsub.f32 %v99_v32, %v1861_v59 }
  0x30   :  { %179 = vmatprep.mubr.f32.mxu0 %v1514_v1  ;;  %391 = vmatprep.subr.mxu0 %v1614_v15  ;;  %v307_v25 = vand.u32 4294901760, %v306_v55  ;;  %v2192_v3 = vand.u32 4294901760, %v1760_v49  ;;  %v2193_v15 = vand.u32 4294901760, %v1835_v52 }
  0x31   :  { %298 = vmatpush1.msra.mxu1 %v297_v56  ;;  %v1876_v31 = vsub.f32 %v102_v62, %v1867_v63  ;;  %393 = vmatpush1.msra.mxu0 %v1616_v16  ;;  %v193_v18 = vand.u32 4294901760, %v1872_v13 }
  0x32   :  { %303 = vmatprep.subr.mxu1 %v302_v60  ;;  %185 = vmatmul.mubr.f32.gmra.mxu0 %v184_v57 }
  0x33   :  { %395 = vmatprep.subr.mxu0 %v1630_v19  ;;  %v204_v43 = vand.u32 4294901760, %v1876_v31  ;;  %190 = vmatprep.mubr.f32.mxu0 %v1514_v1  ;;  %v194_v32 = vsub.f32 %v1872_v13, %v193_v18 }
  0x34   :  { %397 = vmatpush1.msra.mxu0 %v1632_v20  ;;  %308 = vmatpush1.msra.mxu1 %v307_v25 }
  0x35   :  { %399 = vmatprep.subr.mxu0 %v1658_v23  ;;  %v205_v60 = vsub.f32 %v1876_v31, %v204_v43  ;;  %v195_v45 = vand.u32 4294901760, %v194_v32  ;;  %343 = vmatmul.mubr.f32.vlgmr.msra.gmra.mxu1 %v1808_v21 }
  0x36   :  { %401 = vmatpush1.msra.mxu0 %v1660_v24  ;;  %1332 = vmatprep.subr.msk.mxu1 %vm70_vm0, %v1515_v12 }
  0x37   :  { %403 = vmatprep.subr.mxu0 %v1674_v27  ;;  %196 = vmatmul.mubr.f32.gmra.mxu0 %v195_v45  ;;  %v206_v46 = vand.u32 4294901760, %v205_v60 }
  0x38   :  { %1333 = vmatpush1.msk.msra.mxu1 %vm69_vm1, %v1515_v12  ;;  %405 = vmatpush1.msra.mxu0 %v1676_v28 }
  0x39   :  { %201 = vmatprep.mubr.f32.mxu0 %v1514_v1  ;;  %407 = vmatprep.subr.mxu0 %v1704_v33 }
  0x3a   :  { %1334 = vmatprep.subr.msk.mxu1 %vm68_vm2, %v1515_v12  ;;  %409 = vmatpush1.msra.mxu0 %v1718_v38 }
  0x3b   :  { %348 = vmatprep.mubr.f32.mxu1 %v1514_v1  ;;  %207 = vmatmul.mubr.f32.gmra.mxu0 %v206_v46 }
  0x3c   :  { %411 = vmatprep.subr.mxu0 %v1744_v44  ;;  %1335 = vmatpush1.msk.msra.mxu1 %vm67_vm3, %v1515_v12 }
  0x3d   :  { %413 = vmatpush1.msra.mxu0 %v1760_v49  ;;  %350 = vmatmul.mubr.f32.gmra.mxu1 %v1824_v42 }
  0x3e   :  { %1336 = vmatprep.subr.msk.mxu1 %vm66_vm4, %v1515_v12  ;;  %415 = vmatprep.subr.mxu0 %v1787_v58 }
  0x3f   :  { %1337 = vmatpush1.msk.msra.mxu1 %vm65_vm5, %v1515_v12  ;;  %417 = vmatpush1.msra.mxu0 %v1801_v0 }
  0x40   :  { %450 = vmatprep.mubr.f32.mxu0 %v1514_v1  ;;  %1338 = vmatprep.subr.msk.mxu1 %vm64_vm6, %v1515_v12 }
  0x41   :  { %355 = vmatprep.mubr.f32.mxu1 %v1514_v1  ;;  %453 = vmatmul.mubr.f32.vlgmr.msra.gmra.mxu0 %v1819_v35 }
  0x42   :  { %1339 = vmatpush1.msk.msra.mxu1 %vm63_vm7, %v1515_v12  ;;  %602 = vmatprep.subr.mxu0 %v230_v37 }
  0x43   :  { %357 = vmatmul.mubr.f32.gmra.mxu1 %v1861_v59  ;;  %1340 = vmatprep.subr.msk.mxu1 %vm62_vm8, %v1515_v12 }
  0x44   :  { %605 = vmatpush1.msra.mxu0 %v235_v40  ;;  %1341 = vmatpush1.msk.msra.mxu1 %vm61_vm9, %v1515_v12 }
  0x45   :  { %608 = vmatprep.subr.mxu0 %v240_v36  ;;  %458 = vmatprep.mubr.f32.mxu0 %v1514_v1 }
  0x46   :  { %1342 = vmatprep.subr.msk.mxu1 %vm60_vm11, %v1515_v12  ;;  %611 = vmatpush1.msra.mxu0 %v245_v39 }
  0x47   :  { %362 = vmatprep.mubr.f32.mxu1 %v1514_v1  ;;  %461 = vmatmul.mubr.f32.gmra.mxu0 %v1835_v52 }
  0x48   :  { %1343 = vmatpush1.msk.msra.mxu1 %vm59_vm12, %v1515_v12  ;;  %614 = vmatprep.subr.mxu0 %v250_v50 }
  0x49   :  { %364 = vmatmul.mubr.f32.gmra.mxu1 %v1867_v63  ;;  %1344 = vmatprep.subr.msk.mxu1 %vm2191_vm10, %v1515_v12 }
  0x4a   :  { %617 = vmatpush1.msra.mxu0 %v255_v53  ;;  %1345 = vmatpush1.msk.msra.mxu1 %vm57_vm14, %v1515_v12 }
  0x4b   :  { %620 = vmatprep.subr.mxu0 %v260_v61  ;;  %466 = vmatprep.mubr.f32.mxu0 %v1514_v1 }
  0x4c   :  { %1346 = vmatprep.subr.msk.mxu1 %vm56_vm15, %v1515_v12  ;;  %623 = vmatpush1.msra.mxu0 %v265_v14 }
  0x4d   :  { %1347 = vmatpush1.msk.msra.mxu1 %vm55_vm13, %v1515_v12  ;;  %469 = vmatmul.mubr.f32.gmra.mxu0 %v1872_v13 }
  0x4e   :  { %547 = vmatprep.mubr.f32.mxu1 %v1514_v1  ;;  %626 = vmatprep.subr.mxu0 %v270_v22 }
  0x4f   :  { %551 = vmatmul.mubr.f32.vlgmr.msra.gmra.mxu1 %v171_v48  ;;  %629 = vmatpush1.msra.mxu0 %v275_v26 }
  0x50   :  { %1348 = vmatprep.subr.msk.mxu1 %vm70_vm0, %v1515_v12  ;;  %632 = vmatprep.subr.mxu0 %v280_v29  ;;  %vm2194_vm0 = vmmov %vm2191_vm10 }
  0x51   :  { %1349 = vmatpush1.msk.msra.mxu1 %vm69_vm1, %v1515_v12  ;;  %474 = vmatprep.mubr.f32.mxu0 %v1514_v1  ;;  %vm1516_vm1 = vmmov 0  }
  0x52   :  { %635 = vmatpush1.msra.mxu0 %v285_v47  ;;  %1350 = vmatprep.subr.msk.mxu1 %vm68_vm2, %v1515_v12  ;;  %vm809_vm2 = vcmask 261120  }
  0x53   :  { %477 = vmatmul.mubr.f32.gmra.mxu0 %v1876_v31  ;;  %556 = vmatprep.mubr.f32.mxu1 %v1514_v1 }
  0x54   :  { %638 = vmatprep.subr.mxu0 %v290_v54  ;;  %1351 = vmatpush1.msk.msra.mxu1 %vm67_vm3, %v1515_v12  ;;  %v806_v54 = vld [vmem:[%s2185_s3] sm:$0x1] }
  0x55   :  { %641 = vmatpush1.msra.mxu0 %v2192_v3  ;;  %560 = vmatmul.mubr.f32.gmra.mxu1 %v2193_v15  ;;  %v811_v31 = vsel %vm809_vm2, %v806_v54, 0 }
  0x56   :  { %1352 = vmatprep.subr.msk.mxu1 %vm66_vm4, %v1515_v12  ;;  %644 = vmatprep.subr.mxu0 %v300_v17 }
  0x57   :  { %1353 = vmatpush1.msk.msra.mxu1 %vm65_vm5, %v1515_v12  ;;  %647 = vmatpush1.msra.mxu0 %v305_v41 }
  0x58   :  { %680 = vmatprep.mubr.f32.mxu0 %v1514_v1  ;;  %1354 = vmatprep.subr.msk.mxu1 %vm64_vm6, %v1515_v12 }
  0x59   :  { %565 = vmatprep.mubr.f32.mxu1 %v1514_v1  ;;  %682 = vmatmul.mubr.f32.vlgmr.msra.gmra.mxu0 %v1808_v21 }
  0x5a   :  { %1355 = vmatpush1.msk.msra.mxu1 %vm63_vm7, %v1515_v12  ;;  %687 = vmatprep.mubr.f32.mxu0 %v1514_v1 }
  0x5b   :  { %569 = vmatmul.mubr.f32.gmra.mxu1 %v193_v18  ;;  %1356 = vmatprep.subr.msk.mxu1 %vm62_vm8, %v1515_v12 }
  0x5c   :  { %1357 = vmatpush1.msk.msra.mxu1 %vm61_vm9, %v1515_v12  ;;  %574 = vmatprep.mubr.f32.mxu1 %v1514_v1 }
  0x5d   :  { %1358 = vmatprep.subr.msk.mxu1 %vm60_vm11, %v1515_v12  ;;  %689 = vmatmul.mubr.f32.gmra.mxu0 %v1824_v42 }
  0x5e   :  { %1359 = vmatpush1.msk.msra.mxu1 %vm59_vm12, %v1515_v12  ;;  %694 = vmatprep.mubr.f32.mxu0 %v1514_v1 }
  0x5f   :  { %578 = vmatmul.mubr.f32.gmra.mxu1 %v204_v43  ;;  %1360 = vmatprep.subr.msk.mxu1 %vm2194_vm0, %v1515_v12 }
  0x60   :  { %1361 = vmatpush1.msk.msra.mxu1 %vm57_vm14, %v1515_v12  ;;  %773 = vmatprep.mubr.f32.mxu1 %v1514_v1 }
  0x61   :  { %1362 = vmatprep.subr.msk.mxu1 %vm56_vm15, %v1515_v12  ;;  %696 = vmatmul.mubr.f32.gmra.mxu0 %v1861_v59 }
  0x62   :  { %1363 = vmatpush1.msk.msra.mxu1 %vm55_vm13, %v1515_v12  ;;  %701 = vmatprep.mubr.f32.mxu0 %v1514_v1 }
  0x63   :  { %775 = vmatmul.mubr.f32.vlgmr.msra.gmra.mxu1 %v1808_v21  ;;  %1394 = vmatprep.subr.mxu0 %v1514_v1 }
  0x64   :  { %780 = vmatprep.mubr.f32.mxu1 %v1514_v1  ;;  %1405 = vmatprep.subr.mxu1 %v1514_v1 }
  0x65   :  { %703 = vmatmul.mubr.f32.gmra.mxu0 %v1867_v63 }
  0x66   :  { %1402 = vmatprep.mubr.msk.f32.mxu0 %vm1516_vm1, %v1514_v1 }
  0x67   :  { %782 = vmatmul.mubr.f32.gmra.mxu1 %v1824_v42 }
  0x68   :  { %787 = vmatprep.mubr.f32.mxu1 %v1514_v1 }
  0x6b   :  { %789 = vmatmul.mubr.f32.gmra.mxu1 %v1861_v59 }
  0x6c   :  { %794 = vmatprep.mubr.f32.mxu1 %v1514_v1 }
  0x6f   :  { %796 = vmatmul.mubr.f32.gmra.mxu1 %v1867_v63 }
  0x70   :  { %1413 = vmatprep.mubr.msk.f32.mxu1 %vm1516_vm1, %v1514_v1 }
  0xee   :  { %v175_v2 = vpop.f32.mrf.mxu0 }
  0xf0   :  { %v177_v4 = vpop.f32.mrf.mxu0 }
  0xf2   :  { %v186_v5 = vpop.f32.mrf.mxu0 }
  0xf4   :  { %v188_v6 = vpop.f32.mrf.mxu0 }
  0xf5   :  { %v344_v7 = vpop.f32.mrf.mxu1 }
  0xf6   :  { %v345_v63 = vadd.f32 %v344_v7, %v175_v2 }
  0xf7   :  { %v197_v8 = vpop.f32.mrf.mxu0  ;;  %v346_v10 = vpop.f32.mrf.mxu1 }
  0xf8   :  { %v347_v47 = vadd.f32 %v346_v10, %v177_v4 }
  0xf9   :  { %v199_v9 = vpop.f32.mrf.mxu0 }
  0xfb   :  { %v208_v11 = vpop.f32.mrf.mxu0 }
  0xfd   :  { %v351_v12 = vpop.f32.mrf.mxu1  ;;  %v210_v16 = vpop.f32.mrf.mxu0 }
  0xfe   :  { %v352_v48 = vadd.f32 %v351_v12, %v186_v5 }
  0xff   :  { %v353_v19 = vpop.f32.mrf.mxu1 }
 0x100   :  { %v354_v29 = vadd.f32 %v353_v19, %v188_v6 }
 0x101   :  { %v454_v20 = vpop.f32.mrf.mxu0 }
 0x102   :  { %v455_v57 = vadd.f32 %v454_v20, %v345_v63  ;;  %v2113_v20 = vand.u32 4294901760, %v811_v31 }
 0x103   :  { %v358_v23 = vpop.f32.mrf.mxu1  ;;  %v456_v24 = vpop.f32.mrf.mxu0 }
 0x104   :  { %v359_v17 = vadd.f32 %v358_v23, %v197_v8  ;;  %v457_v56 = vadd.f32 %v456_v24, %v347_v47 }
 0x105   :  { %v360_v27 = vpop.f32.mrf.mxu1 }
 0x106   :  { %v361_v59 = vadd.f32 %v360_v27, %v199_v9 }
 0x107   :  { %v462_v28 = vpop.f32.mrf.mxu0 }
 0x108   :  { %v463_v55 = vadd.f32 %v462_v28, %v352_v48 }
 0x109   :  { %v365_v30 = vpop.f32.mrf.mxu1  ;;  %v464_v33 = vpop.f32.mrf.mxu0 }
 0x10a   :  { %v465_v52 = vadd.f32 %v464_v33, %v354_v29  ;;  %v366_v45 = vadd.f32 %v365_v30, %v208_v11 }
 0x10b   :  { %v367_v34 = vpop.f32.mrf.mxu1 }
 0x10c   :  { %v368_v46 = vadd.f32 %v367_v34, %v210_v16 }
 0x10d   :  { %v470_v36 = vpop.f32.mrf.mxu0 }
 0x10e   :  { %v471_v13 = vadd.f32 %v470_v36, %v359_v17 }
 0x10f   :  { %v552_v37 = vpop.f32.mrf.mxu1  ;;  %v472_v38 = vpop.f32.mrf.mxu0 }
 0x110   :  { %v473_v18 = vadd.f32 %v472_v38, %v361_v59  ;;  %v553_v3 = vadd.f32 %v552_v37, %v455_v57 }
 0x111   :  { %v554_v39 = vpop.f32.mrf.mxu1 }
 0x112   :  { %v555_v43 = vadd.f32 %v554_v39, %v457_v56 }
 0x113   :  { %v478_v40 = vpop.f32.mrf.mxu0 }
 0x114   :  { %v479_v9 = vadd.f32 %v478_v40, %v366_v45  ;;  %v2116_v40 = vsub.f32 %v811_v31, %v2113_v20 }
 0x115   :  { %v561_v44 = vpop.f32.mrf.mxu1  ;;  %v480_v49 = vpop.f32.mrf.mxu0 }
 0x116   :  { %v562_v32 = vadd.f32 %v561_v44, %v463_v55  ;;  %v481_v10 = vadd.f32 %v480_v49, %v368_v46 }
 0x117   :  { %v563_v50 = vpop.f32.mrf.mxu1 }
 0x118   :  { %v564_v62 = vadd.f32 %v563_v50, %v465_v52 }
 0x119   :  { %v683_v53 = vpop.f32.mrf.mxu0 }
 0x11a   :  { %v684_v12 = vadd.f32 %v683_v53, %v553_v3 }
 0x11b   :  { %v570_v58 = vpop.f32.mrf.mxu1  ;;  %v685_v61 = vpop.f32.mrf.mxu0 }
 0x11c   :  { %v571_v15 = vadd.f32 %v570_v58, %v471_v13  ;;  %v686_v5 = vadd.f32 %v685_v61, %v555_v43 }
 0x11d   :  { %v572_v0 = vpop.f32.mrf.mxu1  ;;  %v690_v14 = vpop.f32.mrf.mxu0 }
 0x11e   :  { %v573_v6 = vadd.f32 %v572_v0, %v473_v18  ;;  %v691_v7 = vadd.f32 %v690_v14, %v562_v32 }
 0x11f   :  { %v579_v21 = vpop.f32.mrf.mxu1  ;;  %v692_v22 = vpop.f32.mrf.mxu0 }
 0x120   :  { %v693_v60 = vadd.f32 %v692_v22, %v564_v62  ;;  %v580_v11 = vadd.f32 %v579_v21, %v479_v9  ;;  %v884_v22 = vand.u32 4294901760, %v2116_v40 }
 0x121   :  { %v581_v26 = vpop.f32.mrf.mxu1  ;;  %v697_v35 = vpop.f32.mrf.mxu0 }
 0x122   :  { %v698_v23 = vadd.f32 %v697_v35, %v571_v15  ;;  %v582_v16 = vadd.f32 %v581_v26, %v481_v10  ;;  %v885_v48 = vsub.f32 %v2116_v40, %v884_v22 }
 0x123   :  { %v776_v42 = vpop.f32.mrf.mxu1  ;;  %v699_v41 = vpop.f32.mrf.mxu0 }
 0x124   :  { %v700_v24 = vadd.f32 %v699_v41, %v573_v6  ;;  %v777_v34 = vadd.f32 %v776_v42, %v684_v12 }
 0x125   :  { %v778_v51 = vpop.f32.mrf.mxu1  ;;  %v704_v2 = vpop.f32.mrf.mxu0 }
 0x126   :  { %v779_v27 = vadd.f32 %v778_v51, %v686_v5  ;;  %v705_v49 = vadd.f32 %v704_v2, %v580_v11  ;;  %v886_v51 = vand.u32 4294901760, %v885_v48 }
 0x127   :  { %v783_v25 = vpop.f32.mrf.mxu1  ;;  %v706_v30 = vpop.f32.mrf.mxu0 }
 0x128   :  { %v784_v28 = vadd.f32 %v783_v25, %v691_v7  ;;  %v802_v44 = vmul.f32 %v779_v27, %v777_v34  ;;  %v707_v50 = vadd.f32 %v706_v30, %v582_v16 }
 0x129   :  { %v785_v4 = vpop.f32.mrf.mxu1 }
 0x12a   :  { %v786_v8 = vadd.f32 %v785_v4, %v693_v60  ;;  %v2123_v26 = vand.u32 4294901760, %v802_v44  ;;  %v808_v60 = vstv %s2186_s4  ;;  %s1487_s4 = scalar_lea.vmem %s1306_s30, 16 }
 0x12b   :  { %v790_v19 = vpop.f32.mrf.mxu1  ;;  %p1488_p5 = scmp.ne.s32.totalorder %s1306_s30, %s1487_s4  ;;  %p1493_p7 = scmp.lt.s32.totalorder %s1491_s6, %s1487_s4 }
 0x12c   :  { %v803_v36 = vmul.f32 %v786_v8, %v784_v28  ;;  %v791_v37 = vadd.f32 %v790_v19, %v698_v23  ;;  %v939_v52 = vsub.f32 %v802_v44, %v2123_v26 }
 0x12d   :  { %v792_v33 = vpop.f32.mrf.mxu1  ;;  %p1494_p8 = por %p1493_p7, %p1492_p6 }
 0x12e   :  { %v793_v38 = vadd.f32 %v792_v33, %v700_v24  ;;  %v2118_v61 = vand.u32 4294901760, %v803_v36  ;;  %v940_v56 = vand.u32 4294901760, %v939_v52 }
 0x12f   :  { %v797_v39 = vpop.f32.mrf.mxu1  ;;  %p1495_p9 = pnand %p1494_p8, %p1488_p5 }
 0x130   :  { %v804_v53 = vmul.f32 %v793_v38, %v791_v37  ;;  %v798_v14 = vadd.f32 %v797_v39, %v705_v49  ;;  %v932_v42 = vsub.f32 %v803_v36, %v2118_v61  ;;  %v941_v25 = vsub.f32 %v939_v52, %v940_v56 }
 0x131   :  { %v799_v58 = vpop.f32.mrf.mxu1 }
 0x132   :  { %v2120_v0 = vand.u32 4294901760, %v804_v53  ;;  %v800_v21 = vadd.f32 %v799_v58, %v707_v50  ;;  %v933_v17 = vand.u32 4294901760, %v932_v42  ;;  %v942_v18 = vand.u32 4294901760, %v941_v25 }
 0x134   :  { %v925_v29 = vsub.f32 %v804_v53, %v2120_v0  ;;  %v805_v35 = vmul.f32 %v800_v21, %v798_v14  ;;  %v934_v57 = vsub.f32 %v932_v42, %v933_v17 }
 0x136   :  { %v838_v47 = vand.u32 4294901760, %v805_v35  ;;  %v926_v54 = vand.u32 4294901760, %v925_v29  ;;  %v935_v31 = vand.u32 4294901760, %v934_v57 }
 0x138   :  { %v918_v63 = vsub.f32 %v805_v35, %v838_v47  ;;  %1395 = vmatpush3.msra.mxu0 %v838_v47  ;;  %v927_v55 = vsub.f32 %v925_v29, %v926_v54 }
 0x139   :  { %1396 = vmatprep.subr.mxu0 %v1514_v1 }
 0x13a   :  { %v919_v41 = vand.u32 4294901760, %v918_v63  ;;  %1397 = vmatpush3.msra.mxu0 %v2120_v0  ;;  %v928_v13 = vand.u32 4294901760, %v927_v55 }
 0x13b   :  { %1398 = vmatprep.subr.mxu0 %v1514_v1 }
 0x13c   :  { %1399 = vmatpush3.msra.mxu0 %v2118_v61  ;;  %v920_v59 = vsub.f32 %v918_v63, %v919_v41 }
 0x13d   :  { %1400 = vmatprep.subr.mxu0 %v1514_v1 }
 0x13e   :  { %1401 = vmatpush3.msra.mxu0 %v2123_v26  ;;  %v921_v62 = vand.u32 4294901760, %v920_v59 }
 0x13f   :  { %1416 = vmatprep.subr.mxu0 %v1514_v1  ;;  %1403 = vmatmul.mubr.f32.vlgmr.msra.gmra.mxu0 %v886_v51 }
 0x140   :  { %1406 = vmatpush3.msra.mxu1 %v921_v62  ;;  %1417 = vmatpush3.msra.mxu0 %v918_v63 }
 0x141   :  { %1407 = vmatprep.subr.mxu1 %v1514_v1  ;;  %1418 = vmatprep.subr.mxu0 %v1514_v1 }
 0x142   :  { %1408 = vmatpush3.msra.mxu1 %v928_v13  ;;  %1419 = vmatpush3.msra.mxu0 %v925_v29 }
 0x143   :  { %1409 = vmatprep.subr.mxu1 %v1514_v1  ;;  %1420 = vmatprep.subr.mxu0 %v1514_v1 }
 0x144   :  { %1410 = vmatpush3.msra.mxu1 %v935_v31  ;;  %1421 = vmatpush3.msra.mxu0 %v932_v42 }
 0x145   :  { %1411 = vmatprep.subr.mxu1 %v1514_v1  ;;  %1422 = vmatprep.subr.mxu0 %v1514_v1 }
 0x146   :  { %1412 = vmatpush3.msra.mxu1 %v942_v18  ;;  %1423 = vmatpush3.msra.mxu0 %v939_v52 }
 0x147   :  { %1424 = vmatprep.mubr.msk.f32.mxu0 %vm1516_vm1, %v1514_v1  ;;  %1427 = vmatprep.subr.mxu1 %v1514_v1 }
 0x148   :  { %1438 = vmatprep.subr.mxu0 %v1514_v1  ;;  %1414 = vmatmul.mubr.f32.vlgmr.msra.gmra.mxu1 %v2113_v20 }
 0x149   :  { %1425 = vmatmul.mubr.f32.vlgmr.msra.gmra.mxu0 %v2116_v40  ;;  %1428 = vmatpush3.msra.mxu1 %v838_v47 }
 0x14a   :  { %1439 = vmatpush3.msra.mxu0 %v919_v41  ;;  %1429 = vmatprep.subr.mxu1 %v1514_v1 }
 0x14b   :  { %1440 = vmatprep.subr.mxu0 %v1514_v1  ;;  %1430 = vmatpush3.msra.mxu1 %v2120_v0 }
 0x14c   :  { %1441 = vmatpush3.msra.mxu0 %v926_v54  ;;  %1431 = vmatprep.subr.mxu1 %v1514_v1 }
 0x14d   :  { %1442 = vmatprep.subr.mxu0 %v1514_v1  ;;  %1432 = vmatpush3.msra.mxu1 %v2118_v61 }
 0x14e   :  { %1443 = vmatpush3.msra.mxu0 %v933_v17  ;;  %1433 = vmatprep.subr.mxu1 %v1514_v1 }
 0x14f   :  { %1444 = vmatprep.subr.mxu0 %v1514_v1  ;;  %1434 = vmatpush3.msra.mxu1 %v2123_v26 }
 0x150   :  { %1445 = vmatpush3.msra.mxu0 %v940_v56  ;;  %1435 = vmatprep.mubr.msk.f32.mxu1 %vm1516_vm1, %v1514_v1 }
 0x151   :  { %1449 = vmatprep.subr.mxu1 %v1514_v1  ;;  %1436 = vmatmul.mubr.f32.vlgmr.msra.gmra.mxu1 %v884_v22 }
 0x152   :  { %1450 = vmatpush3.msra.mxu1 %v838_v47  ;;  %1446 = vmatprep.mubr.msk.f32.mxu0 %vm1516_vm1, %v1514_v1 }
 0x153   :  { %1451 = vmatprep.subr.mxu1 %v1514_v1  ;;  %1447 = vmatmul.mubr.f32.vlgmr.msra.gmra.mxu0 %v2113_v20 }
 0x154   :  { %1452 = vmatpush3.msra.mxu1 %v2120_v0  ;;  %1457 = vmatprep.mubr.msk.f32.mxu1 %vm1516_vm1, %v1514_v1 }
 0x155   :  { %1453 = vmatprep.subr.mxu1 %v1514_v1 }
 0x156   :  { %1454 = vmatpush3.msra.mxu1 %v2118_v61 }
 0x157   :  { %1455 = vmatprep.subr.mxu1 %v1514_v1 }
 0x158   :  { %1456 = vmatpush3.msra.mxu1 %v2123_v26 }
 0x159   :  { %1458 = vmatmul.mubr.f32.vlgmr.msra.gmra.mxu1 %v2113_v20 }
 0x1ff   :  { %v888_v43 = vpop.f32.mrf.mxu0 }
 0x200   :  { %v889_v3 = vadd.f32 %v888_v43, %v808_v60 }
 0x201   :  { %v1404_v32 = vpop.f32.mrf.mxu0 }
 0x208   :  { %v979_v45 = vpop.f32.mrf.mxu1 }
 0x209   :  { %v1059_v46 = vpop.f32.mrf.mxu0  ;;  %v980_v4 = vadd.f32 %v979_v45, %v889_v3 }
 0x20a   :  { %v1415_v15 = vpop.f32.mrf.mxu1 }
 0x20b   :  { %v1426_v2 = vpop.f32.mrf.mxu0  ;;  %v1060_v6 = vadd.f32 %v1059_v46, %v980_v4 }
 0x211   :  { %v1136_v5 = vpop.f32.mrf.mxu1 }
 0x212   :  { %v1137_v8 = vadd.f32 %v1136_v5, %v1060_v6 }
 0x213   :  { %v1437_v7 = vpop.f32.mrf.mxu1  ;;  %v1219_v1 = vpop.f32.mrf.mxu0 }
 0x214   :  { %v1220_v10 = vadd.f32 %v1219_v1, %v1137_v8 }
 0x215   :  { %v1448_v9 = vpop.f32.mrf.mxu0 }
 0x219   :  { %v1294_v12 = vpop.f32.mrf.mxu1 }
 0x21a   :  { %v1295_v19 = vadd.f32 %v1294_v12, %v1220_v10 }
 0x21b   :  { %v1459_v20 = vpop.f32.mrf.mxu1 }
 0x21c   :  { %1298 = vst [vmem:[#allocation6] sm:$0x1] %v1295_v19 }
 0x21d   :  { %1498 = shalt.err (!%p1495_p9)
}
 0x21e   :  { %1308 = dma.vmem_to_hbm [thread:$0]  %s1306_s30, 16, %s2187_s5, [#allocation5]  }
 0x21f   :  { %1509 = dma.done.wait [#allocation5], 16  }
 0x220   :  { %1510 = vsyncadd [#allocation5], 4294967280 }
 0x221   :  { %1312 = vsyncpa [#allocation4], 1 }
 0x222   :  { %1313 = vsyncpa [#allocation5], 1 }

</bundles_post_ra>
